<compile_context>
chip_gen: v7x
topology: tpu7x:2x2x1
jax: 0.10.0
libtpu: 0.0.40
codegen_flags: <defaults>
</compile_context>

<pallas_src>
import jax
import jax.numpy as jnp
from jax.experimental import pallas as pl
from jax.experimental.pallas import tpu as pltpu


def _round_up(x, m):
    return ((x + m - 1) // m) * m


def _choose_spatial_tiling(hw, tile_n, batch):
    """Pick (tile, padded_extent) for the flattened spatial (lane) axis.

    Prefers a 128-multiple tile that divides round_up(hw, 128) so that no jnp.pad
    HBM pass is needed for 128-aligned feature maps, and keeps >= ~8 grid steps
    when possible so v7x megacore still gets several pipelined steps per core.
    """
    cap = max(128, (int(tile_n) // 128) * 128)
    hw128 = _round_up(hw, 128)
    if hw128 <= cap:
        tn = hw128
    else:
        tn = 128
        t = cap
        while t >= 128:                      # largest 128-multiple divisor <= cap
            if hw128 % t == 0:
                tn = t
                break
            t -= 128
        if tn < min(512, cap):               # divisor too small -> pad instead
            tn = cap
    hw_pad = _round_up(hw, tn)
    # keep enough grid steps for megacore sharding / double-buffer overlap
    while batch * (hw_pad // tn) < 8 and tn >= 1024 and tn % 256 == 0:
        tn //= 2
    return tn, hw_pad


def _make_fused_kernel(hsum, mid_rows, sum_classes, compute_dtype, bf16_epilogue):
    """Kernel computing every head's per-pixel MLP on one spatial tile.

    Refs: (x_ref, w0, wmid_0..wmid_{L-1}, wfinal, bias_all, out_ref, h_scratch)
      x_ref    : (1, Cin, tn)                input pixels (lanes = pixels)
      w0       : (hsum, Cin)                 stacked layer-0 weights (bf16)
      wmid_l   : (rows_l, rows_l)            block-diag deeper hidden layers (bf16)
      wfinal   : (sum_classes, hsum)         block-diag final layers (bf16)
      bias_all : (hsum + sum(rows) + sum_classes, 1)  f32
      out_ref  : (1, sum_classes, tn)        concatenated head outputs
      h_scratch: (hsum, tn)                  persistent VMEM hidden state
    """
    n_mid = len(mid_rows)

    def kernel(*refs):
        x_ref = refs[0]
        w0_ref = refs[1]
        wmid_refs = refs[2:2 + n_mid]
        wfin_ref = refs[2 + n_mid]
        b_ref = refs[3 + n_mid]
        out_ref = refs[4 + n_mid]
        h_ref = refs[5 + n_mid]

        def hidden_epilogue(acc_f32, b_f32):
            if bf16_epilogue:
                # v6e/v7x: bf16 VALU -> half the vregs for the bias/ReLU pass.
                return jnp.maximum(acc_f32.astype(compute_dtype)
                                   + b_f32.astype(compute_dtype), 0.0)
            return jnp.maximum(acc_f32 + b_f32, 0.0).astype(compute_dtype)

        # Pixels on lanes, channels on sublanes; cast to the MXU compute dtype
        # inside the kernel (no extra wrapper-side HBM pass).
        x = x_ref[0].astype(compute_dtype)                      # (Cin, tn)

        # ---- layer 0: every head's first 1x1 conv in ONE stacked matmul.
        acc = jnp.dot(w0_ref[...], x, preferred_element_type=jnp.float32)
        h_ref[...] = hidden_epilogue(acc, b_ref[0:hsum, :])

        # ---- extra hidden layers of the deeper heads: they occupy the leading
        #      rows of the hidden state and are updated in place.
        boff = hsum
        for li, rows in enumerate(mid_rows):
            acc = jnp.dot(wmid_refs[li][...], h_ref[0:rows, :],
                          preferred_element_type=jnp.float32)
            h_ref[0:rows, :] = hidden_epilogue(acc, b_ref[boff:boff + rows, :])
            boff += rows

        # ---- final layers of all heads: one block-diagonal matmul + ONE
        #      lane-dense full-block store of the whole output slab.
        acc = jnp.dot(wfin_ref[...], h_ref[...], preferred_element_type=jnp.float32)
        out_ref[0] = (acc + b_ref[boff:boff + sum_classes, :]).astype(out_ref.dtype)

    return kernel


def _pack_params(params, in_channels, compute_dtype):
    """Stack / block-diagonalize all heads' 1x1-conv weights and biases."""
    head_names = list(params.keys())
    # Deepest heads first -> their hidden channels form the leading rows of the
    # stacked hidden state, so deeper levels touch a contiguous prefix.
    order = sorted(head_names, key=lambda h: -len(params[h][0]))

    depths, widths, classes = {}, {}, {}
    for h in order:
        ws, _ = params[h]
        if len(ws) < 2:
            raise NotImplementedError(
                "TODO(synk): heads with num_conv == 1 are not supported by the "
                "fused SepHead kernel")
        for w in ws:
            if w.ndim != 2:
                raise NotImplementedError(
                    "TODO(synk): final_kernel > 1 (true spatial conv) not supported")
        if ws[0].shape[1] != in_channels:
            raise ValueError(f"head {h}: layer-0 weight expects Cin={ws[0].shape[1]}, "
                             f"feature map has {in_channels}")
        depths[h] = len(ws) - 1                 # number of hidden layers
        widths[h] = int(ws[0].shape[0])         # hidden width (== head_conv)
        classes[h] = int(ws[-1].shape[0])

    f32 = jnp.float32
    hsum = sum(widths[h] for h in order)
    sum_classes = sum(classes[h] for h in order)
    max_depth = max(depths[h] for h in order)

    hid_off, off = {}, 0
    for h in order:
        hid_off[h] = off
        off += widths[h]

    # layer 0: plain row-stack across all heads
    w0 = jnp.concatenate([params[h][0][0].astype(compute_dtype) for h in order], 0)
    bias_parts = [jnp.concatenate([params[h][1][0].astype(f32) for h in order])]

    # deeper hidden levels: block-diagonal over the deep-head prefix
    wmids, mid_rows = [], []
    for lvl in range(1, max_depth):
        deep = [h for h in order if depths[h] > lvl]
        rows = sum(widths[h] for h in deep)
        wm = jnp.zeros((rows, rows), f32)
        bm = jnp.zeros((rows,), f32)
        r = 0
        for h in deep:
            w_l, b_l = params[h][0][lvl], params[h][1][lvl]
            if w_l.shape != (widths[h], widths[h]):
                raise ValueError(
                    "SepHead with num_conv > 2 requires head_conv == in_channels "
                    f"(head {h} hidden weight has shape {w_l.shape})")
            wm = wm.at[r:r + widths[h], r:r + widths[h]].set(w_l.astype(f32))
            bm = bm.at[r:r + widths[h]].set(b_l.astype(f32))
            r += widths[h]
        wmids.append(wm.astype(compute_dtype))
        mid_rows.append(rows)
        bias_parts.append(bm)

    # final layers: block-diagonal over all heads
    wf = jnp.zeros((sum_classes, hsum), f32)
    bf = jnp.zeros((sum_classes,), f32)
    cls_off, co = {}, 0
    for h in order:
        w_l, b_l = params[h][0][-1], params[h][1][-1]
        if w_l.shape != (classes[h], widths[h]):
            raise ValueError(f"head {h}: final weight shape {w_l.shape} mismatch")
        cls_off[h] = co
        wf = wf.at[co:co + classes[h], hid_off[h]:hid_off[h] + widths[h]].set(
            w_l.astype(f32))
        bf = bf.at[co:co + classes[h]].set(b_l.astype(f32))
        co += classes[h]
    wf = wf.astype(compute_dtype)
    bias_parts.append(bf)
    bias_all = jnp.concatenate(bias_parts).reshape(-1, 1)

    return dict(w0=w0, wmids=wmids, wfinal=wf, bias=bias_all,
                mid_rows=tuple(mid_rows), hsum=hsum, sum_classes=sum_classes,
                classes=classes, cls_off=cls_off)


def sep_head_forward(x_nchw, params, *, tile_n=4096, compute_dtype=jnp.bfloat16,
                     out_dtype=jnp.float32, bf16_epilogue=False):
    """Fused SepHead forward (final_kernel=1, bn=False).

    x_nchw : (B, Cin, H, W).  Prefer bf16 features on v5e/v6e (halves the
             dominant HBM read); the cast to the MXU dtype happens in-kernel.
    params : dict head -> (list of (Cout, Cin) weights, list of (Cout,) biases).
    out_dtype : f32 matches the PyTorch module; bf16 trims writeback traffic.
    bf16_epilogue : hidden bias+ReLU in bf16 (v6e/v7x only; v5e has no bf16 VALU).
    Returns dict head -> (B, classes, H, W) in out_dtype.
    """
    B, C, H, W = x_nchw.shape
    HW = H * W
    tn, HW_pad = _choose_spatial_tiling(HW, tile_n, B)

    x = x_nchw.reshape(B, C, HW)                 # zero-copy from NCHW
    if HW_pad != HW:
        # Only triggers when H*W is not a multiple of the chosen 128-aligned tile.
        # TODO(synk): in-kernel ragged-tail masking would avoid this extra HBM pass.
        x = jnp.pad(x, ((0, 0), (0, 0), (0, HW_pad - HW)))

    packed = _pack_params(params, C, compute_dtype)
    hsum, sum_classes = packed["hsum"], packed["sum_classes"]

    const_map = lambda b, n: (0, 0)
    in_specs = [pl.BlockSpec((1, C, tn), lambda b, n: (b, 0, n)),
                pl.BlockSpec(packed["w0"].shape, const_map)]
    in_specs += [pl.BlockSpec(wm.shape, const_map) for wm in packed["wmids"]]
    in_specs += [pl.BlockSpec(packed["wfinal"].shape, const_map),
                 pl.BlockSpec(packed["bias"].shape, const_map)]

    kernel = _make_fused_kernel(hsum, packed["mid_rows"], sum_classes,
                                compute_dtype, bf16_epilogue)

    out = pl.pallas_call(
        kernel,
        out_shape=jax.ShapeDtypeStruct((B, sum_classes, HW_pad), out_dtype),
        grid_spec=pltpu.PrefetchScalarGridSpec(
            num_scalar_prefetch=0,
            grid=(B, HW_pad // tn),
            in_specs=in_specs,
            out_specs=pl.BlockSpec((1, sum_classes, tn), lambda b, n: (b, 0, n)),
            scratch_shapes=[pltpu.VMEM((hsum, tn), compute_dtype)],
        ),
        compiler_params=pltpu.CompilerParams(
            dimension_semantics=("parallel", "parallel"),
        ),
    )(x, packed["w0"], *packed["wmids"], packed["wfinal"], packed["bias"])

    # Slice the concatenated channel slab back into per-head NCHW outputs
    # (cheap channel-axis views, no transposes).
    ret = {}
    for h in params.keys():
        co, cls = packed["cls_off"][h], packed["classes"][h]
        ret[h] = out[:, co:co + cls, :HW].reshape(B, cls, H, W)
    return ret


def init_sep_head_params(key, in_channels, heads, head_conv=64, final_kernel=1,
                         bn=False, init_bias=-2.19):
    """Deterministic init mirroring SepHead.__init__ (final_kernel=1, bn=False).

    Weights stored as (Cout, Cin) (squeezed 1x1 Conv2d layout).  'hm' heads get
    the final bias filled with init_bias; others use kaiming-normal (fan_out).
    """
    if final_kernel != 1:
        raise NotImplementedError("TODO(synk): final_kernel > 1 not supported")
    if bn:
        raise NotImplementedError("TODO(synk): bn=True (BatchNorm2d) not supported")
    params = {}
    for head, (classes, num_conv) in heads.items():
        ws, bs = [], []
        cin = in_channels
        for _ in range(num_conv - 1):
            key, sub = jax.random.split(key)
            std = jnp.sqrt(2.0 / head_conv)        # kaiming normal, fan_out, relu
            ws.append(std * jax.random.normal(sub, (head_conv, cin), jnp.float32))
            bs.append(jnp.zeros((head_conv,), jnp.float32))
            cin = head_conv
        key, sub = jax.random.split(key)
        std = jnp.sqrt(2.0 / classes)
        ws.append(std * jax.random.normal(sub, (classes, cin), jnp.float32))
        if 'hm' in head:
            bs.append(jnp.full((classes,), init_bias, jnp.float32))
        else:
            bs.append(jnp.zeros((classes,), jnp.float32))
        params[head] = (ws, bs)
    return params


def _reference_forward(x_nchw, params, compute_dtype=jnp.bfloat16):
    """Plain-JAX per-head reference of the same per-pixel MLP (mirrors dtypes)."""
    B, C, H, W = x_nchw.shape
    x = x_nchw.reshape(B, C, H * W).astype(compute_dtype)
    ret = {}
    for head, (ws, bs) in params.items():
        h = x
        out = None
        for li, (w, b) in enumerate(zip(ws, bs)):
            acc = jnp.einsum('oc,bcn->bon', w.astype(compute_dtype), h,
                             preferred_element_type=jnp.float32)
            acc = acc + b.astype(jnp.float32).reshape(1, -1, 1)
            if li + 1 < len(ws):
                h = jnp.maximum(acc, 0.0).astype(compute_dtype)
            else:
                out = acc
        ret[head] = out.reshape(B, ws[-1].shape[0], H, W)
    return ret


if __name__ == "__main__":
    # Typical CenterPoint SepHead config (small synthetic shapes).
    in_channels = 32
    head_conv = 32                 # == in_channels (required for num_conv>2 heads)
    heads = {
        'reg':    (2, 2),
        'height': (1, 2),
        'dim':    (3, 2),
        'rot':    (2, 2),
        'hm':     (3, 3),          # deeper head exercises the mid-level path
    }

    key = jax.random.PRNGKey(0)
    key, xkey = jax.random.split(key)
    params = init_sep_head_params(key, in_channels, heads, head_conv=head_conv)

    # --- Test 1: 128-aligned spatial size (no-pad path), f32 input, f32 output ---
    B, H, W = 2, 16, 16
    x = jax.random.normal(xkey, (B, in_channels, H, W), jnp.float32)

    out = sep_head_forward(x, params)
    out = jax.tree_util.tree_map(jax.block_until_ready, out)

    ref = _reference_forward(x, params, compute_dtype=jnp.bfloat16)
    ref_f32 = _reference_forward(x, params, compute_dtype=jnp.float32)
    for head in heads:
        assert out[head].shape == (B, heads[head][0], H, W), (head, out[head].shape)
        # tight check vs a reference using identical bf16/f32-acc math
        assert jnp.allclose(out[head], ref[head], atol=2e-3, rtol=2e-3), head
        # loose sanity check vs the original module's full-f32 math
        assert jnp.allclose(out[head], ref_f32[head], atol=1e-1, rtol=1e-1), head

    # --- Test 2: unaligned spatial size (exercises the pad fallback), bf16 input ---
    B2, H2, W2 = 1, 13, 11
    key, xkey2 = jax.random.split(key)
    x2 = jax.random.normal(xkey2, (B2, in_channels, H2, W2), jnp.float32)
    x2 = x2.astype(jnp.bfloat16)

    out2 = sep_head_forward(x2, params)
    out2 = jax.tree_util.tree_map(jax.block_until_ready, out2)
    ref2 = _reference_forward(x2, params, compute_dtype=jnp.bfloat16)
    for head in heads:
        assert out2[head].shape == (B2, heads[head][0], H2, W2), head
        assert jnp.allclose(out2[head], ref2[head], atol=2e-3, rtol=2e-3), head

    # --- Test 3: bf16 epilogue (v6e/v7x) + bf16 output (reduced writeback) ---
    out3 = sep_head_forward(x, params, out_dtype=jnp.bfloat16, bf16_epilogue=True)
    out3 = jax.tree_util.tree_map(jax.block_until_ready, out3)
    for head in heads:
        assert out3[head].dtype == jnp.bfloat16, head
        assert jnp.allclose(out3[head].astype(jnp.float32), ref[head],
                            atol=1e-1, rtol=5e-2), head

    print("KERNEL_OK")
</pallas_src>

<mosaic_0001>
module attributes {stable_mosaic.version = 11 : i64} {
  func.func @kernel(%arg0: i32, %arg1: i32, %arg2: memref<1x32x256xf32, #tpu.memory_space<vmem>>, %arg3: memref<160x32xbf16, #tpu.memory_space<vmem>>, %arg4: memref<32x32xbf16, #tpu.memory_space<vmem>>, %arg5: memref<11x160xbf16, #tpu.memory_space<vmem>>, %arg6: memref<203x1xf32, #tpu.memory_space<vmem>>, %arg7: memref<1x11x256xf32, #tpu.memory_space<vmem>>, %arg8: memref<160x256xbf16, #tpu.memory_space<vmem>>) attributes {dimension_semantics = [#tpu.dimension_semantics<parallel>, #tpu.dimension_semantics<parallel>], iteration_bounds = array<i64: 2, 1>, scalar_prefetch = 0 : i64, scratch_operands = 1 : i64, tpu.core_type = #tpu.core_type<tc>, window_params = [{transform_indices = @transform_0, window_bounds = array<i64: 1, 32, 256>}, {pipeline_mode = #tpu.pipeline_mode<synchronous>, transform_indices = @transform_1, window_bounds = array<i64: 160, 32>}, {pipeline_mode = #tpu.pipeline_mode<synchronous>, transform_indices = @transform_2, window_bounds = array<i64: 32, 32>}, {pipeline_mode = #tpu.pipeline_mode<synchronous>, transform_indices = @transform_3, window_bounds = array<i64: 11, 160>}, {pipeline_mode = #tpu.pipeline_mode<synchronous>, transform_indices = @transform_4, window_bounds = array<i64: 203, 1>}, {transform_indices = @transform_5, window_bounds = array<i64: 1, 11, 256>}]} {
    %c0 = arith.constant 0 : index
    %c0_0 = arith.constant 0 : index
    %c0_1 = arith.constant 0 : index
    %0 = vector.load %arg2[%c0, %c0_0, %c0_1] : memref<1x32x256xf32, #tpu.memory_space<vmem>>, vector<1x32x256xf32>
    %1 = vector.shape_cast %0 : vector<1x32x256xf32> to vector<32x256xf32>
    %2 = arith.truncf %1 : vector<32x256xf32> to vector<32x256xbf16>
    %c0_2 = arith.constant 0 : index
    %c0_3 = arith.constant 0 : index
    %3 = vector.load %arg3[%c0_2, %c0_3] : memref<160x32xbf16, #tpu.memory_space<vmem>>, vector<160x32xbf16>
    %cst = arith.constant dense<0.000000e+00> : vector<160x256xf32>
    %4 = tpu.matmul %3, %2, %cst {dimension_numbers = #tpu.dot_dimension_numbers<[1], [0], [0], [1], [0, 0, 1, 1], [], []>} : vector<160x32xbf16>, vector<32x256xbf16>, vector<160x256xf32> -> vector<160x256xf32>
    %c0_4 = arith.constant 0 : index
    %c0_5 = arith.constant 0 : index
    %5 = vector.load %arg6[%c0_4, %c0_5] : memref<203x1xf32, #tpu.memory_space<vmem>>, vector<160x1xf32>
    %6 = vector.broadcast %5 : vector<160x1xf32> to vector<160x256xf32>
    %7 = arith.addf %4, %6 : vector<160x256xf32>
    %cst_6 = arith.constant 0.000000e+00 : f32
    %8 = vector.broadcast %cst_6 : f32 to vector<160x256xf32>
    %9 = arith.maximumf %7, %8 : vector<160x256xf32>
    %10 = arith.truncf %9 : vector<160x256xf32> to vector<160x256xbf16>
    %c0_7 = arith.constant 0 : index
    %c0_8 = arith.constant 0 : index
    %11 = vector.load %arg8[%c0_7, %c0_8] : memref<160x256xbf16, #tpu.memory_space<vmem>>, vector<160x256xbf16>
    tpu.vector_store %arg8[%c0_7, %c0_8], %10 {strides = array<i32>} : memref<160x256xbf16, #tpu.memory_space<vmem>>, vector<160x256xbf16>,
    %c0_9 = arith.constant 0 : index
    %c0_10 = arith.constant 0 : index
    %12 = vector.load %arg4[%c0_9, %c0_10] : memref<32x32xbf16, #tpu.memory_space<vmem>>, vector<32x32xbf16>
    %c0_11 = arith.constant 0 : index
    %c0_12 = arith.constant 0 : index
    %13 = vector.load %arg8[%c0_11, %c0_12] : memref<160x256xbf16, #tpu.memory_space<vmem>>, vector<32x256xbf16>
    %cst_13 = arith.constant dense<0.000000e+00> : vector<32x256xf32>
    %14 = tpu.matmul %12, %13, %cst_13 {dimension_numbers = #tpu.dot_dimension_numbers<[1], [0], [0], [1], [0, 0, 1, 1], [], []>} : vector<32x32xbf16>, vector<32x256xbf16>, vector<32x256xf32> -> vector<32x256xf32>
    %c160 = arith.constant 160 : index
    %c0_14 = arith.constant 0 : index
    %15 = vector.load %arg6[%c160, %c0_14] : memref<203x1xf32, #tpu.memory_space<vmem>>, vector<32x1xf32>
    %16 = vector.broadcast %15 : vector<32x1xf32> to vector<32x256xf32>
    %17 = arith.addf %14, %16 : vector<32x256xf32>
    %cst_15 = arith.constant 0.000000e+00 : f32
    %18 = vector.broadcast %cst_15 : f32 to vector<32x256xf32>
    %19 = arith.maximumf %17, %18 : vector<32x256xf32>
    %20 = arith.truncf %19 : vector<32x256xf32> to vector<32x256xbf16>
    %c0_16 = arith.constant 0 : index
    %c0_17 = arith.constant 0 : index
    %21 = vector.load %arg8[%c0_16, %c0_17] : memref<160x256xbf16, #tpu.memory_space<vmem>>, vector<32x256xbf16>
    tpu.vector_store %arg8[%c0_16, %c0_17], %20 {strides = array<i32>} : memref<160x256xbf16, #tpu.memory_space<vmem>>, vector<32x256xbf16>,
    %c0_18 = arith.constant 0 : index
    %c0_19 = arith.constant 0 : index
    %22 = vector.load %arg5[%c0_18, %c0_19] : memref<11x160xbf16, #tpu.memory_space<vmem>>, vector<11x160xbf16>
    %c0_20 = arith.constant 0 : index
    %c0_21 = arith.constant 0 : index
    %23 = vector.load %arg8[%c0_20, %c0_21] : memref<160x256xbf16, #tpu.memory_space<vmem>>, vector<160x256xbf16>
    %cst_22 = arith.constant dense<0.000000e+00> : vector<11x256xf32>
    %24 = tpu.matmul %22, %23, %cst_22 {dimension_numbers = #tpu.dot_dimension_numbers<[1], [0], [0], [1], [0, 0, 1, 1], [], []>} : vector<11x160xbf16>, vector<160x256xbf16>, vector<11x256xf32> -> vector<11x256xf32>
    %c192 = arith.constant 192 : index
    %c0_23 = arith.constant 0 : index
    %25 = vector.load %arg6[%c192, %c0_23] : memref<203x1xf32, #tpu.memory_space<vmem>>, vector<11x1xf32>
    %26 = vector.broadcast %25 : vector<11x1xf32> to vector<11x256xf32>
    %27 = arith.addf %24, %26 : vector<11x256xf32>
    %c0_24 = arith.constant 0 : index
    %c0_25 = arith.constant 0 : index
    %c0_26 = arith.constant 0 : index
    %28 = vector.load %arg7[%c0_24, %c0_25, %c0_26] : memref<1x11x256xf32, #tpu.memory_space<vmem>>, vector<1x11x256xf32>
    %29 = vector.shape_cast %28 : vector<1x11x256xf32> to vector<11x256xf32>
    %30 = vector.shape_cast %27 : vector<11x256xf32> to vector<1x11x256xf32>
    tpu.vector_store %arg7[%c0_24, %c0_25, %c0_26], %30 {strides = array<i32>} : memref<1x11x256xf32, #tpu.memory_space<vmem>>, vector<1x11x256xf32>,
    return
  }
  func.func @transform_0(%arg0: i32, %arg1: i32) -> (i32, i32, i32) {
    %c0_i32 = arith.constant 0 : i32
    %c0_i32_0 = arith.constant 0 : i32
    return %arg0, %c0_i32, %arg1 : i32, i32, i32
  }
  func.func @transform_1(%arg0: i32, %arg1: i32) -> (i32, i32) {
    %c0_i32 = arith.constant 0 : i32
    %c0_i32_0 = arith.constant 0 : i32
    %c0_i32_1 = arith.constant 0 : i32
    return %c0_i32, %c0_i32_0 : i32, i32
  }
  func.func @transform_2(%arg0: i32, %arg1: i32) -> (i32, i32) {
    %c0_i32 = arith.constant 0 : i32
    %c0_i32_0 = arith.constant 0 : i32
    %c0_i32_1 = arith.constant 0 : i32
    return %c0_i32, %c0_i32_0 : i32, i32
  }
  func.func @transform_3(%arg0: i32, %arg1: i32) -> (i32, i32) {
    %c0_i32 = arith.constant 0 : i32
    %c0_i32_0 = arith.constant 0 : i32
    %c0_i32_1 = arith.constant 0 : i32
    return %c0_i32, %c0_i32_0 : i32, i32
  }
  func.func @transform_4(%arg0: i32, %arg1: i32) -> (i32, i32) {
    %c0_i32 = arith.constant 0 : i32
    %c0_i32_0 = arith.constant 0 : i32
    %c0_i32_1 = arith.constant 0 : i32
    return %c0_i32, %c0_i32_0 : i32, i32
  }
  func.func @transform_5(%arg0: i32, %arg1: i32) -> (i32, i32, i32) {
    %c0_i32 = arith.constant 0 : i32
    %c0_i32_0 = arith.constant 0 : i32
    return %arg0, %c0_i32, %arg1 : i32, i32, i32
  }
}

</mosaic_0001>

<bundles_post_ra>
// kernel: tpu_custom_call.1
= control target key start
LH: loop header
LB: loop body
LE: loop exit
PB: predicated region body
PF: predicated region fallthrough
CT: control target
= control target key end

     0   :  { %s1149_s18 = smov 0   ;;  %s1151_s19 = smov 0   ;;  %s1437_s0 = inlined_call_operand.vmem [shape: f32[2,32,256], index: 0, kind: input, shape index: {}]   ;;  %s1438_s1 = inlined_call_operand.vmem [shape: bf16[160,32], index: 1, kind: input, shape index: {}]   ;;  %s1439_s2 = inlined_call_operand.vmem [shape: bf16[32,32], index: 2, kind: input, shape index: {}]   ;;  %s1440_s3 = inlined_call_operand.vmem [shape: bf16[11,160], index: 3, kind: input, shape index: {}]   ;;  %s1441_s4 = inlined_call_operand.vmem [shape: f32[203,1], index: 4, kind: input, shape index: {}]   ;;  %s1442_s5 = inlined_call_operand.vmem [shape: f32[2,11,256], index: 5, kind: output, shape index: {}]  }
   0x1   :  { %s1153_s20 = smov 0  }
   0x2 LB: > { %s27_s21 = sadd.s32 1, %s1112_s19  ;;  %p1012_p0 = scmp.ge.s32.totalorder %s1116_s20, 1  ;;  %s1116_s20 = sphi %s1153_s20, %s15_s20   ;;  %s1112_s19 = sphi %s1151_s19, %s1444_s19   ;;  %s1108_s18 = sphi %s1149_s18, %s1443_s18  }
   0x3   : > { %p29_p1 = scmp.ge.s32.totalorder %s27_s21, 2  ;;  %p208_p2 = scmp.lt.s32.totalorder %s1116_s20, 3 }
   0x5   : > { %s1446_s21 = smov (%p29_p1, %s27_s21), 0  ;;  %p209_p3 = pnand %p1012_p0, %p208_p2 }
   0x6   : > { %p245_p4 = scmp.lt.s32.totalorder (!%p209_p3), %s1108_s18, 1  ;;  %v1118_v0 = vmov (!%p209_p3), 0   ;;  %v297_v13 = vld [vmem:[%s1441_s4] sm:$0xff] (!%p209_p3)  ;;  %v299_v14 = vld [vmem:[%s1441_s4 + $0x10] sm:$0xff] (!%p209_p3)  ;;  %v298_v17 = vld [vmem:[%s1441_s4 + $0x8] sm:$0xff] (!%p209_p3)  ;;  %vm467_vm0 = vcmask (!%p209_p3), 261120  }
   0x7   : > { %212 = sbr.rel (%p209_p3) target bundleno = 744 (0x2e8), region = 40  ;;  %530 = vmatprep.mubr.bf16.mxu0 (!%p209_p3), %v1118_v0  ;;  %610 = vmatprep.mubr.bf16.mxu1 (!%p209_p3), %v1118_v0  ;;  %v1079_v15 = vld [vmem:[%s1438_s1] sm:$0xff] (!%p209_p3)   ;;  %v300_v18 = vld [vmem:[%s1441_s4 + $0x18] sm:$0xff] (!%p209_p3)  ;;  %v720_v20 = vld [vmem:[%s1441_s4 + $0xa8] sm:$0xff] (!%p209_p3) }
   0x8   : > { %1077 = vset.pattern.permute.xlu0 (!%p209_p3), %v1118_v0  ;;  %1078 = vset.pattern.permute.xlu1 (!%p209_p3), %v1118_v0  ;;  %v1080_v16 = vld [vmem:[%s1438_s1 + $0x40] sm:$0xff] (!%p209_p3)   ;;  %v1081_v21 = vld [vmem:[%s1438_s1 + $0x8] sm:$0xff] (!%p209_p3)   ;;  %v721_v23 = vld [vmem:[%s1441_s4 + $0xb0] sm:$0xff] (!%p209_p3) }
   0x9   : > { %319 = vperm.xlu0 (!%p209_p3), %1077, %v297_v13   ;;  %329 = vperm.xlu1 (!%p209_p3), %1078, %v299_v14   ;;  %v719_v19 = vld [vmem:[%s1441_s4 + $0xa0] sm:$0xff] (!%p209_p3)  ;;  %v1082_v22 = vld [vmem:[%s1438_s1 + $0x48] sm:$0xff] (!%p209_p3)   ;;  %v722_v24 = vld [vmem:[%s1441_s4 + $0xb8] sm:$0xff] (!%p209_p3) }
   0xa   : > { %v301_v25 = vld [vmem:[%s1441_s4 + $0x20] sm:$0xff] (!%p209_p3)  ;;  %v302_v26 = vld [vmem:[%s1441_s4 + $0x28] sm:$0xff] (!%p209_p3)  ;;  %v1083_v27 = vld [vmem:[%s1438_s1 + $0x10] sm:$0xff] (!%p209_p3)  }
   0xb   : > { %v303_v28 = vld [vmem:[%s1441_s4 + $0x30] sm:$0xff] (!%p209_p3)  ;;  %v304_v29 = vld [vmem:[%s1441_s4 + $0x38] sm:$0xff] (!%p209_p3)  ;;  %v305_v30 = vld [vmem:[%s1441_s4 + $0x40] sm:$0xff] (!%p209_p3) }
   0xc   : > { %v306_v31 = vld [vmem:[%s1441_s4 + $0x48] sm:$0xff] (!%p209_p3)  ;;  %v1084_v32 = vld [vmem:[%s1438_s1 + $0x18] sm:$0xff] (!%p209_p3)   ;;  %v307_v33 = vld [vmem:[%s1441_s4 + $0x50] sm:$0xff] (!%p209_p3) }
   0xd   : > { %324 = vperm.xlu0 (!%p209_p3), %1077, %v298_v17   ;;  %334 = vperm.xlu1 (!%p209_p3), %1078, %v300_v18   ;;  %v308_v34 = vld [vmem:[%s1441_s4 + $0x58] sm:$0xff] (!%p209_p3)  ;;  %v309_v35 = vld [vmem:[%s1441_s4 + $0x60] sm:$0xff] (!%p209_p3)  ;;  %v310_v36 = vld [vmem:[%s1441_s4 + $0x68] sm:$0xff] (!%p209_p3) }
   0xe   : > { %s1448_s18 = smov (!%p245_p4, %s1108_s18), 1  ;;  %v1085_v37 = vld [vmem:[%s1438_s1 + $0x20] sm:$0xff]   ;;  %v311_v38 = vld [vmem:[%s1441_s4 + $0x70] sm:$0xff]  ;;  %v312_v39 = vld [vmem:[%s1441_s4 + $0x78] sm:$0xff] }
   0xf   : > { %s1046_s22 = sshll.u32 %s1448_s18, 6  ;;  %v313_v40 = vld [vmem:[%s1441_s4 + $0x80] sm:$0xff]  ;;  %v314_v41 = vld [vmem:[%s1441_s4 + $0x88] sm:$0xff]  ;;  %v315_v43 = vld [vmem:[%s1441_s4 + $0x90] sm:$0xff] }
  0x10   : > { %s252_s25 = scalar_lea.vmem %s1437_s0, %s1046_s22  ;;  %v1086_v42 = vld [vmem:[%s1438_s1 + $0x28] sm:$0xff]   ;;  %v316_v44 = vld [vmem:[%s1441_s4 + $0x98] sm:$0xff]  ;;  %v850_v45 = vld [vmem:[%s1441_s4 + $0xc0] sm:$0xff]  ;;  %s1047_s22 = sshll.u32 %s1448_s18, 5 }
  0x11   : > { %v266_v1 = vld [vmem:[%s252_s25 + $0x8] sm:$0xff]  ;;  %v268_v2 = vld [vmem:[%s252_s25 + $0x18] sm:$0xff]  ;;  %v265_v3 = vld [vmem:[%s252_s25] sm:$0xff]  ;;  %725 = vperm.xlu0 %1077, %v719_v19   ;;  %730 = vperm.xlu1 %1078, %v720_v20  }
  0x12   : > { %v274_v4 = vpack.c.bf16 %v268_v2, %v266_v1  ;;  %v267_v5 = vld [vmem:[%s252_s25 + $0x10] sm:$0xff]  ;;  %v270_v6 = vld [vmem:[%s252_s25 + $0x28] sm:$0xff]  ;;  %v272_v7 = vld [vmem:[%s252_s25 + $0x38] sm:$0xff] }
  0x13   : > { %v273_v8 = vpack.c.bf16 %v267_v5, %v265_v3  ;;  %v276_v9 = vpack.c.bf16 %v272_v7, %v270_v6  ;;  %v269_v10 = vld [vmem:[%s252_s25 + $0x20] sm:$0xff]  ;;  %v271_v11 = vld [vmem:[%s252_s25 + $0x30] sm:$0xff]  ;;  %v851_v46 = vld [vmem:[%s1441_s4 + $0xc8] sm:$0x7]  ;;  %s262_s25 = scalar_lea.vmem %s1442_s5, %s1047_s22 }
  0x14   : > { %498 = vmatprep.subr.bf16.mxu0 %v274_v4  ;;  %1048 = vmatprep.subr.bf16.mxu1 %v274_v4  ;;  %v275_v12 = vpack.c.bf16 %v271_v11, %v269_v10  ;;  %v1087_v47 = vld [vmem:[%s1438_s1 + $0x30] sm:$0xff]   ;;  %v1088_v48 = vld [vmem:[%s1438_s1 + $0x38] sm:$0xff]  }
  0x15   : > { %499 = vmatpush1.bf16.msra.mxu0 %v273_v8  ;;  %1050 = vmatpush1.bf16.msra.mxu1 %v273_v8 }
  0x16   : > { %500 = vmatprep.subr.bf16.mxu0 %v276_v9  ;;  %1049 = vmatprep.subr.bf16.mxu1 %v276_v9 }
  0x17   : > { %735 = vperm.xlu0 %1077, %v721_v23   ;;  %740 = vperm.xlu1 %1078, %v722_v24  }
  0x19   : > { %501 = vmatpush1.bf16.msra.mxu0 %v275_v12  ;;  %1051 = vmatpush1.bf16.msra.mxu1 %v275_v12 }
  0x1b   : > { %339 = vperm.xlu0 %1077, %v301_v25   ;;  %344 = vperm.xlu1 %1078, %v302_v26  }
  0x1c   : > { %1027 = vmatmul.mubr.msk.bf16.vlgmr.msra.gmra.mrb[0].mxu0 %vm467_vm0, %v1079_v15  ;;  %1035 = vmatmul.mubr.msk.bf16.vlgmr.msra.gmra.mrb[0].mxu1 %vm467_vm0, %v1080_v16 }
  0x1d   : > { %540 = vmatprep.mubr.bf16.mxu0 %v1118_v0  ;;  %620 = vmatprep.mubr.bf16.mxu1 %v1118_v0 }
  0x1f   : > { %349 = vperm.xlu0 %1077, %v303_v28   ;;  %354 = vperm.xlu1 %1078, %v304_v29  }
  0x23   : > { %359 = vperm.xlu0 %1077, %v305_v30   ;;  %364 = vperm.xlu1 %1078, %v306_v31  }
  0x24   : > { %1028 = vmatmul.mubr.msk.bf16.gmra.mrb[4].mxu0 %vm467_vm0, %v1081_v21  ;;  %1036 = vmatmul.mubr.msk.bf16.gmra.mrb[4].mxu1 %vm467_vm0, %v1082_v22 }
  0x25   : > { %550 = vmatprep.mubr.bf16.mxu0 %v1118_v0  ;;  %791 = vmatprep.mubr.bf16.mxu1 %v1118_v0 }
  0x27   : > { %369 = vperm.xlu0 %1077, %v307_v33   ;;  %374 = vperm.xlu1 %1078, %v308_v34  }
  0x2b   : > { %379 = vperm.xlu0 %1077, %v309_v35   ;;  %384 = vperm.xlu1 %1078, %v310_v36  }
  0x2c   : > { %1029 = vmatmul.mubr.msk.bf16.gmra.mrb[8].mxu0 %vm467_vm0, %v1083_v27 }
  0x2d   : > { %560 = vmatprep.mubr.bf16.mxu0 %v1118_v0 }
  0x2f   : > { %389 = vperm.xlu0 %1077, %v311_v38   ;;  %394 = vperm.xlu1 %1078, %v312_v39  }
  0x33   : > { %399 = vperm.xlu0 %1077, %v313_v40   ;;  %404 = vperm.xlu1 %1078, %v314_v41  }
  0x34   : > { %1030 = vmatmul.mubr.msk.bf16.gmra.mrb[12].mxu0 %vm467_vm0, %v1084_v32 }
  0x35   : > { %570 = vmatprep.mubr.bf16.mxu0 %v1118_v0 }
  0x37   : > { %409 = vperm.xlu0 %1077, %v315_v43   ;;  %414 = vperm.xlu1 %1078, %v316_v44  }
  0x3b   : > { %854 = vperm.xlu0 %1077, %v850_v45   ;;  %859 = vperm.xlu1 %1078, %v851_v46  }
  0x3c   : > { %1031 = vmatmul.mubr.msk.bf16.gmra.mrb[16].mxu0 %vm467_vm0, %v1085_v37 }
  0x3d   : > { %580 = vmatprep.mubr.bf16.mxu0 %v1118_v0 }
  0x44   : > { %1032 = vmatmul.mubr.msk.bf16.gmra.mrb[20].mxu0 %vm467_vm0, %v1086_v42 }
  0x45   : > { %590 = vmatprep.mubr.bf16.mxu0 %v1118_v0 }
  0x4c   : > { %1033 = vmatmul.mubr.msk.bf16.gmra.mrb[24].mxu0 %vm467_vm0, %v1087_v47 }
  0x4d   : > { %600 = vmatprep.mubr.bf16.mxu0 %v1118_v0 }
  0x54   : > { %1034 = vmatmul.mubr.msk.bf16.gmra.mrb[28].mxu0 %vm467_vm0, %v1088_v48 }
  0x88   : > { %v320_v49 = vpop.permute.xlu0 %319  ;;  %v330_v50 = vpop.permute.xlu1 %329 }
  0x8c   : > { %v325_v51 = vpop.permute.xlu0 %324  ;;  %v1304_v52 = vpop.permute.xlu1 %334 }
  0x90   : > { %v1306_v53 = vpop.permute.xlu0 %725  ;;  %v1308_v54 = vpop.permute.xlu1 %730 }
  0x96   : > { %v1310_v55 = vpop.permute.xlu0 %735  ;;  %v1312_v56 = vpop.permute.xlu1 %740 }
  0x9a   : > { %v1314_v57 = vpop.permute.xlu0 %339  ;;  %v1316_v58 = vpop.permute.xlu1 %344 }
  0x9e   : > { %v1318_v59 = vpop.permute.xlu0 %349  ;;  %v1320_v60 = vpop.permute.xlu1 %354 }
  0xa2   : > { %v1322_v61 = vpop.permute.xlu0 %359  ;;  %v1324_v62 = vpop.permute.xlu1 %364 }
  0xa6   : > { %v1326_v63 = vpop.permute.xlu0 %369  ;;  %v1328_v1 = vpop.permute.xlu1 %374 }
  0xaa   : > { %v1330_v2 = vpop.permute.xlu0 %379  ;;  %v1332_v3 = vpop.permute.xlu1 %384 }
  0xae   : > { %v1334_v4 = vpop.permute.xlu0 %389  ;;  %v1336_v5 = vpop.permute.xlu1 %394 }
  0xb2   : > { %v400_v6 = vpop.permute.xlu0 %399  ;;  %v405_v7 = vpop.permute.xlu1 %404 }
  0xb6   : > { %v410_v32 = vpop.permute.xlu0 %409  ;;  %v415_v35 = vpop.permute.xlu1 %414 }
  0xef   : > { %v532_v8 = vpop.f32.mrb[0].mxu0  ;;  %v612_v9 = vpop.f32.mrb[0].mxu1 }
  0xf0   : > { %v533_v10 = vadd.f32 %v532_v8, %v320_v49  ;;  %v613_v11 = vadd.f32 %v612_v9, %v400_v6  ;;  %v534_v12 = vpop.f32.mrb[1].mxu0  ;;  %v614_v13 = vpop.f32.mrb[1].mxu1 }
  0xf1   : > { %v535_v14 = vadd.f32 %v534_v12, %v320_v49  ;;  %v615_v15 = vadd.f32 %v614_v13, %v400_v6  ;;  %v536_v16 = vpop.f32.mrb[2].mxu0  ;;  %v616_v17 = vpop.f32.mrb[2].mxu1 }
  0xf2   : > { %v663_v18 = vmax.f32 %v613_v11, 0.0  ;;  %v537_v19 = vadd.f32 %v536_v16, %v325_v51  ;;  %v617_v20 = vadd.f32 %v616_v17, %v405_v7  ;;  %v538_v21 = vpop.f32.mrb[3].mxu0  ;;  %v618_v22 = vpop.f32.mrb[3].mxu1  ;;  %v631_v26 = vmax.f32 %v533_v10, 0.0 }
  0xf3   : > { %v664_v23 = vmax.f32 %v615_v15, 0.0  ;;  %v539_v24 = vadd.f32 %v538_v21, %v325_v51  ;;  %v619_v25 = vadd.f32 %v618_v22, %v405_v7  ;;  %v632_v29 = vmax.f32 %v535_v14, 0.0 }
  0xf4   : > { %v633_v27 = vmax.f32 %v537_v19, 0.0  ;;  %v665_v28 = vmax.f32 %v617_v20, 0.0 }
  0xf5   : > { %v634_v30 = vmax.f32 %v539_v24, 0.0  ;;  %v666_v31 = vmax.f32 %v619_v25, 0.0  ;;  %v1089_v24 = vld [vmem:[%s1439_s2] sm:$0xff]  }
  0xf6   : > { %v671_v33 = vpack.c.bf16 %v633_v27, %v631_v26  ;;  %v1338_v34 = vpack.c.bf16 %v665_v28, %v663_v18 }
  0xf7   : > { %v672_v36 = vpack.c.bf16 %v634_v30, %v632_v29  ;;  %v1340_v37 = vpack.c.bf16 %v666_v31, %v664_v23  ;;  %v542_v38 = vpop.f32.mrb[4].mxu0  ;;  %v622_v39 = vpop.f32.mrb[4].mxu1 }
  0xf8   : > { %v543_v40 = vadd.f32 %v542_v38, %v330_v50  ;;  %v623_v41 = vadd.f32 %v622_v39, %v410_v32  ;;  %v544_v42 = vpop.f32.mrb[5].mxu0  ;;  %v624_v43 = vpop.f32.mrb[5].mxu1 }
  0xf9   : > { %v545_v44 = vadd.f32 %v544_v42, %v330_v50  ;;  %v625_v45 = vadd.f32 %v624_v43, %v410_v32  ;;  %v546_v46 = vpop.f32.mrb[6].mxu0  ;;  %v626_v47 = vpop.f32.mrb[6].mxu1  ;;  %759 = vmatprep.subr.bf16.mxu1 %v672_v36 }
  0xfa   : > { %v547_v48 = vadd.f32 %v546_v46, %v1304_v52  ;;  %v627_v49 = vadd.f32 %v626_v47, %v415_v35  ;;  %v548_v51 = vpop.f32.mrb[7].mxu0  ;;  %v628_v6 = vpop.f32.mrb[7].mxu1  ;;  %760 = vmatpush1.bf16.msra.mxu1 %v671_v33  ;;  %v635_v9 = vmax.f32 %v543_v40, 0.0  ;;  %v667_v10 = vmax.f32 %v623_v41, 0.0 }
  0xfb   : > { %v549_v7 = vadd.f32 %v548_v51, %v1304_v52  ;;  %v629_v8 = vadd.f32 %v628_v6, %v415_v35  ;;  %v636_v13 = vmax.f32 %v545_v44, 0.0  ;;  %v668_v14 = vmax.f32 %v625_v45, 0.0 }
  0xfc   : > { %v637_v11 = vmax.f32 %v547_v48, 0.0  ;;  %v669_v12 = vmax.f32 %v627_v49, 0.0 }
  0xfd   : > { %v638_v50 = vmax.f32 %v549_v7, 0.0  ;;  %v670_v15 = vmax.f32 %v629_v8, 0.0 }
  0xfe   : > { %v673_v16 = vpack.c.bf16 %v637_v11, %v635_v9  ;;  %v1344_v17 = vpack.c.bf16 %v669_v12, %v667_v10 }
  0xff   : > { %v674_v18 = vpack.c.bf16 %v638_v50, %v636_v13  ;;  %v1346_v19 = vpack.c.bf16 %v670_v15, %v668_v14  ;;  %v552_v20 = vpop.f32.mrb[8].mxu0 }
 0x100   : > { %v553_v21 = vadd.f32 %v552_v20, %v1314_v57  ;;  %v554_v22 = vpop.f32.mrb[9].mxu0 }
 0x101   : > { %v555_v52 = vadd.f32 %v554_v22, %v1314_v57  ;;  %v556_v23 = vpop.f32.mrb[10].mxu0  ;;  %761 = vmatprep.subr.bf16.mxu1 %v674_v18 }
 0x102   : > { %v557_v25 = vadd.f32 %v556_v23, %v1316_v58  ;;  %v558_v26 = vpop.f32.mrb[11].mxu0  ;;  %762 = vmatpush1.bf16.msra.mxu1 %v673_v16  ;;  %v639_v28 = vmax.f32 %v553_v21, 0.0 }
 0x103   : > { %v559_v27 = vadd.f32 %v558_v26, %v1316_v58  ;;  %v640_v30 = vmax.f32 %v555_v52, 0.0  ;;  %v1090_v58 = vld [vmem:[%s1439_s2 + $0x8] sm:$0xff]  }
 0x104   : > { %v641_v29 = vmax.f32 %v557_v25, 0.0 }
 0x105   : > { %v642_v31 = vmax.f32 %v559_v27, 0.0  ;;  %1039 = vmatmul.mubr.msk.bf16.vlgmr.msra.gmra.mrb[8].mxu1 %vm467_vm0, %v1089_v24 }
 0x106   : > { %v1356_v32 = vpack.c.bf16 %v641_v29, %v639_v28  ;;  %801 = vmatprep.mubr.bf16.mxu1 %v1118_v0 }
 0x107   : > { %v1359_v57 = vpack.c.bf16 %v642_v31, %v640_v30  ;;  %v562_v33 = vpop.f32.mrb[12].mxu0 }
 0x108   : > { %v563_v35 = vadd.f32 %v562_v33, %v1318_v59  ;;  %v564_v36 = vpop.f32.mrb[13].mxu0 }
 0x109   : > { %v565_v38 = vadd.f32 %v564_v36, %v1318_v59  ;;  %v566_v39 = vpop.f32.mrb[14].mxu0 }
 0x10a   : > { %v567_v40 = vadd.f32 %v566_v39, %v1320_v60  ;;  %v568_v41 = vpop.f32.mrb[15].mxu0  ;;  %v643_v43 = vmax.f32 %v563_v35, 0.0 }
 0x10b   : > { %v569_v42 = vadd.f32 %v568_v41, %v1320_v60  ;;  %v644_v44 = vmax.f32 %v565_v38, 0.0 }
 0x10c   : > { %v645_v0 = vmax.f32 %v567_v40, 0.0 }
 0x10d   : > { %v646_v45 = vmax.f32 %v569_v42, 0.0  ;;  %1040 = vmatmul.mubr.msk.bf16.gmra.mrb[12].mxu1 %vm467_vm0, %v1090_v58 }
 0x10e   : > { %v1369_v46 = vpack.c.bf16 %v645_v0, %v643_v43 }
 0x10f   : > { %v1371_v47 = vpack.c.bf16 %v646_v45, %v644_v44  ;;  %v572_v59 = vpop.f32.mrb[16].mxu0 }
 0x110   : > { %v573_v48 = vadd.f32 %v572_v59, %v1322_v61  ;;  %v574_v49 = vpop.f32.mrb[17].mxu0 }
 0x111   : > { %v575_v51 = vadd.f32 %v574_v49, %v1322_v61  ;;  %v576_v6 = vpop.f32.mrb[18].mxu0 }
 0x112   : > { %v577_v7 = vadd.f32 %v576_v6, %v1324_v62  ;;  %v578_v60 = vpop.f32.mrb[19].mxu0  ;;  %v647_v9 = vmax.f32 %v573_v48, 0.0 }
 0x113   : > { %v579_v8 = vadd.f32 %v578_v60, %v1324_v62  ;;  %v648_v11 = vmax.f32 %v575_v51, 0.0  ;;  %v1093_v60 = vld [vmem:[%s1440_s3 + $0x4] ss:$8 sps:$4 sm:$0x3f]  }
 0x114   : > { %v649_v10 = vmax.f32 %v577_v7, 0.0  ;;  %1043 = vmatprep.mubr.msk.bf16.mxu1 %vm467_vm0, %v1093_v60 }
 0x115   : > { %v650_v12 = vmax.f32 %v579_v8, 0.0 }
 0x116   : > { %v1377_v13 = vpack.c.bf16 %v649_v10, %v647_v9 }
 0x117   : > { %v1379_v14 = vpack.c.bf16 %v650_v12, %v648_v11  ;;  %v582_v50 = vpop.f32.mrb[20].mxu0 }
 0x118   : > { %v583_v15 = vadd.f32 %v582_v50, %v1326_v63  ;;  %v584_v16 = vpop.f32.mrb[21].mxu0 }
 0x119   : > { %v585_v61 = vadd.f32 %v584_v16, %v1326_v63  ;;  %v586_v18 = vpop.f32.mrb[22].mxu0 }
 0x11a   : > { %v587_v20 = vadd.f32 %v586_v18, %v1328_v1  ;;  %v588_v21 = vpop.f32.mrb[23].mxu0  ;;  %v651_v22 = vmax.f32 %v583_v15, 0.0 }
 0x11b   : > { %v589_v62 = vadd.f32 %v588_v21, %v1328_v1  ;;  %v652_v23 = vmax.f32 %v585_v61, 0.0 }
 0x11c   : > { %v653_v52 = vmax.f32 %v587_v20, 0.0 }
 0x11d   : > { %v654_v24 = vmax.f32 %v589_v62, 0.0 }
 0x11e   : > { %v1385_v25 = vpack.c.bf16 %v653_v52, %v651_v22 }
 0x11f   : > { %v1387_v26 = vpack.c.bf16 %v654_v24, %v652_v23  ;;  %v592_v27 = vpop.f32.mrb[24].mxu0 }
 0x120   : > { %v593_v28 = vadd.f32 %v592_v27, %v1330_v2  ;;  %v594_v29 = vpop.f32.mrb[25].mxu0 }
 0x121   : > { %v595_v63 = vadd.f32 %v594_v29, %v1330_v2  ;;  %v596_v30 = vpop.f32.mrb[26].mxu0 }
 0x122   : > { %v597_v31 = vadd.f32 %v596_v30, %v1332_v3  ;;  %v598_v33 = vpop.f32.mrb[27].mxu0  ;;  %v655_v35 = vmax.f32 %v593_v28, 0.0 }
 0x123   : > { %v599_v1 = vadd.f32 %v598_v33, %v1332_v3  ;;  %v656_v38 = vmax.f32 %v595_v63, 0.0 }
 0x124   : > { %v657_v36 = vmax.f32 %v597_v31, 0.0 }
 0x125   : > { %v658_v39 = vmax.f32 %v599_v1, 0.0 }
 0x126   : > { %v683_v58 = vpack.c.bf16 %v657_v36, %v655_v35 }
 0x127   : > { %v684_v40 = vpack.c.bf16 %v658_v39, %v656_v38  ;;  %v602_v41 = vpop.f32.mrb[28].mxu0 }
 0x128   : > { %v603_v42 = vadd.f32 %v602_v41, %v1334_v4  ;;  %v604_v43 = vpop.f32.mrb[29].mxu0 }
 0x129   : > { %v605_v0 = vadd.f32 %v604_v43, %v1334_v4  ;;  %v606_v44 = vpop.f32.mrb[30].mxu0 }
 0x12a   : > { %v607_v2 = vadd.f32 %v606_v44, %v1336_v5  ;;  %v608_v45 = vpop.f32.mrb[31].mxu0  ;;  %v659_v48 = vmax.f32 %v603_v42, 0.0 }
 0x12b   : > { %v609_v59 = vadd.f32 %v608_v45, %v1336_v5  ;;  %v660_v49 = vmax.f32 %v605_v0, 0.0 }
 0x12c   : > { %v661_v3 = vmax.f32 %v607_v2, 0.0 }
 0x12d   : > { %v662_v51 = vmax.f32 %v609_v59, 0.0 }
 0x12e   : > { %v685_v6 = vpack.c.bf16 %v661_v3, %v659_v48 }
 0x12f   : > { %v686_v7 = vpack.c.bf16 %v662_v51, %v660_v49 }
 0x1d8   : > { %v793_v8 = vpop.f32.mrb[8].mxu1 }
 0x1d9   : > { %v794_v4 = vadd.f32 %v793_v8, %v1306_v53  ;;  %v795_v9 = vpop.f32.mrb[9].mxu1 }
 0x1da   : > { %v796_v10 = vadd.f32 %v795_v9, %v1306_v53  ;;  %v797_v11 = vpop.f32.mrb[10].mxu1 }
 0x1db   : > { %v798_v5 = vadd.f32 %v797_v11, %v1308_v54  ;;  %v799_v12 = vpop.f32.mrb[11].mxu1  ;;  %v812_v15 = vmax.f32 %v794_v4, 0.0 }
 0x1dc   : > { %v800_v50 = vadd.f32 %v799_v12, %v1308_v54  ;;  %v813_v61 = vmax.f32 %v796_v10, 0.0 }
 0x1dd   : > { %v814_v16 = vmax.f32 %v798_v5, 0.0 }
 0x1de   : > { %v815_v18 = vmax.f32 %v800_v50, 0.0 }
 0x1df   : > { %v820_v20 = vpack.c.bf16 %v814_v16, %v812_v15 }
 0x1e0   : > { %v821_v21 = vpack.c.bf16 %v815_v18, %v813_v61  ;;  %v803_v62 = vpop.f32.mrb[12].mxu1 }
 0x1e1   : > { %v804_v22 = vadd.f32 %v803_v62, %v1310_v55  ;;  %v805_v52 = vpop.f32.mrb[13].mxu1 }
 0x1e2   : > { %v806_v23 = vadd.f32 %v805_v52, %v1310_v55  ;;  %v807_v24 = vpop.f32.mrb[14].mxu1  ;;  %874 = vmatprep.subr.bf16.mxu1 %v821_v21  ;;  %v1091_v55 = vld [vmem:[%s1440_s3] ss:$8 sps:$4 sm:$0x3f]  }
 0x1e3   : > { %v808_v53 = vadd.f32 %v807_v24, %v1312_v56  ;;  %v809_v27 = vpop.f32.mrb[15].mxu1  ;;  %875 = vmatpush1.bf16.msra.mxu1 %v820_v20  ;;  %v816_v28 = vmax.f32 %v804_v22, 0.0 }
 0x1e4   : > { %v810_v54 = vadd.f32 %v809_v27, %v1312_v56  ;;  %v817_v63 = vmax.f32 %v806_v23, 0.0  ;;  %v855_v56 = vpop.permute.xlu0 %854 }
 0x1e5   : > { %v818_v29 = vmax.f32 %v808_v53, 0.0 }
 0x1e6   : > { %v819_v30 = vmax.f32 %v810_v54, 0.0 }
 0x1e7   : > { %v822_v31 = vpack.c.bf16 %v818_v29, %v816_v28 }
 0x1e8   : > { %v823_v33 = vpack.c.bf16 %v819_v30, %v817_v63 }
 0x1ea   : > { %876 = vmatprep.subr.bf16.mxu1 %v823_v33 }
 0x1eb   : > { %877 = vmatpush1.bf16.msra.mxu1 %v822_v31 }
 0x1ec   : > { %878 = vmatprep.subr.bf16.mxu1 %v1359_v57 }
 0x1ef   : > { %879 = vmatpush1.bf16.msra.mxu1 %v1356_v32 }
 0x1f0   : > { %880 = vmatprep.subr.bf16.mxu1 %v1371_v47 }
 0x1f3   : > { %881 = vmatpush1.bf16.msra.mxu1 %v1369_v46  ;;  %v860_v46 = vpop.permute.xlu1 %859 }
 0x1f4   : > { %882 = vmatprep.subr.bf16.mxu1 %v1379_v14 }
 0x1f7   : > { %883 = vmatpush1.bf16.msra.mxu1 %v1377_v13 }
 0x1f8   : > { %884 = vmatprep.subr.bf16.mxu1 %v1387_v26 }
 0x1fb   : > { %885 = vmatpush1.bf16.msra.mxu1 %v1385_v25 }
 0x1fc   : > { %886 = vmatprep.subr.bf16.mxu1 %v684_v40 }
 0x1ff   : > { %887 = vmatpush1.bf16.msra.mxu1 %v683_v58 }
 0x200   : > { %888 = vmatprep.subr.bf16.mxu1 %v686_v7 }
 0x203   : > { %889 = vmatpush1.bf16.msra.mxu1 %v685_v6 }
 0x204   : > { %890 = vmatprep.subr.bf16.mxu1 %v1340_v37 }
 0x207   : > { %891 = vmatpush1.bf16.msra.mxu1 %v1338_v34 }
 0x208   : > { %892 = vmatprep.subr.bf16.mxu1 %v1346_v19 }
 0x20b   : > { %893 = vmatpush1.bf16.msra.mxu1 %v1344_v17 }
 0x20e   : > { %907 = vmatmul.mubr.bf16.vlgmr.msra.gmra.mrb[16].mxu1 %v1091_v55 }
 0x2e1   : > { %v908_v32 = vpop.f32.mrb[16].mxu1 }
 0x2e2   : > { %v909_v57 = vadd.f32 %v908_v32, %v855_v56  ;;  %v910_v37 = vpop.f32.mrb[17].mxu1 }
 0x2e3   : > { %v911_v34 = vadd.f32 %v910_v37, %v855_v56  ;;  %v912_v47 = vpop.f32.mrb[18].mxu1 }
 0x2e4   : > { %917 = vst [vmem:[%s262_s25] sm:$0xff] %v909_v57  ;;  %v913_v19 = vadd.f32 %v912_v47, %v860_v46  ;;  %v914_v13 = vpop.f32.mrb[19].mxu1 }
 0x2e5   : > { %918 = vst [vmem:[%s262_s25 + $0x8] sm:$0xff] %v911_v34  ;;  %v915_v14 = vadd.f32 %v914_v13, %v860_v46 }
 0x2e6   : > { %919 = vst [vmem:[%s262_s25 + $0x10] sm:$0x7] %v913_v19 }
 0x2e7   : > { %920 = vst [vmem:[%s262_s25 + $0x18] sm:$0x7] %v915_v14 }
 0x2e8 PF: > { %s15_s20 = sadd.s32 1, %s1116_s20   ;;  %s1443_s18 = smov %s1112_s19 }
 0x2e9   : > { %p12_p5 = scmp.ge.s32.totalorder %s15_s20, 4   ;;  %s1444_s19 = smov %s1446_s21 }
 0x2eb   :  { %14 = sbr.rel (!%p12_p5) target bundleno = 2 (0x2), region = 70 }

</bundles_post_ra>
